<compile_context>
chip_gen: v7x
topology: tpu7x:2x2x1
jax: 0.10.0
libtpu: 0.0.40
codegen_flags: <defaults>
</compile_context>

<pallas_src>
import functools

import jax
import jax.numpy as jnp
from jax.experimental import pallas as pl
from jax.experimental.pallas import tpu as pltpu

# ---------------------------------------------------------------------------
# hyperparameters (synthetic, small — match the PyTorch module globals)
# ---------------------------------------------------------------------------
N_EMBD = 32
NUM_HEADS = 4
HEAD_SIZE = N_EMBD // NUM_HEADS   # 8
BLOCK_SIZE = 8                    # max sequence length (== T here)
BATCH = 2
DROPOUT = 0.0                     # eval-mode forward: dropout is identity


# ---------------------------------------------------------------------------
# Pallas kernel: one grid step = `seqs` whole sequences (rows = seqs * T)
#   qkv   = x @ Wqkv                        (1 bf16 MXU matmul, f32 acc)
#   q,k,v -> (H*seqs, T, hs) batch layout   (lane slices + axis-0 concat only)
#   S     = batched q @ k^T (contract hs)   -> masked, ONE batched f32 softmax
#   head  = batched P @ v
#   y     = concat(heads) @ Wo + bo         (1 bf16 MXU matmul, f32 acc)
# ---------------------------------------------------------------------------
def _mha_kernel(x_ref, wqkv_ref, wo_ref, bo_ref, o_ref, *,
                seqs, seq, num_heads, head_size):
    Bb, T, H, hs = seqs, seq, num_heads, head_size
    Hh = H * hs

    # bf16 operands into the MXU (f32 matmul is a multi-pass emulation on
    # v5e/v6e/v7x); all accumulation stays f32 via preferred_element_type.
    x_bf = x_ref[...].astype(jnp.bfloat16)                        # (Bb*T, C)

    # ---- fused QKV projection (C**-0.5 scale already folded into Wq) -------
    qkv = jnp.dot(x_bf, wqkv_ref[...],
                  preferred_element_type=jnp.float32)             # (Bb*T, 3*H*hs)

    # ---- regroup to one (H*Bb, T, hs) batch layout --------------------------
    # Wqkv columns are packed head-major, so each head is a contiguous 8-lane
    # slice; the regroup is a leading-axis concat (whole-tile moves), no
    # sublane/lane transpose is emitted.
    def split_heads(col0):
        parts = [qkv[:, col0 + h * hs: col0 + (h + 1) * hs].reshape(Bb, T, hs)
                 for h in range(H)]
        return jnp.concatenate(parts, axis=0).astype(jnp.bfloat16)  # (H*Bb, T, hs)

    q = split_heads(0)
    k = split_heads(Hh)
    v = split_heads(2 * Hh)

    # ---- ONE batched scores matmul: contract head dims directly (no k.T) ---
    scores = jnp.einsum('btd,bsd->bts', q, k,
                        preferred_element_type=jnp.float32)       # (H*Bb, T, T)

    # causal mask shared across batch*heads; finite large-negative is NaN-safe
    # and exp-underflows to exactly 0 in f32.
    row = jax.lax.broadcasted_iota(jnp.int32, (T, T), 0)
    col = jax.lax.broadcasted_iota(jnp.int32, (T, T), 1)
    scores = jnp.where((col <= row)[None], scores, jnp.float32(-1e30))

    # ---- ONE batched, numerically stable softmax (f32 path on every chip) --
    scores = scores - jnp.max(scores, axis=-1, keepdims=True)
    p = jnp.exp(scores)
    p = p * pl.reciprocal(jnp.sum(p, axis=-1, keepdims=True), approx=False)
    # TODO(synk): attention-weight / projection dropout is identity here
    # (eval mode, p=0.0); a training variant would mask with
    # pltpu.prng_random_bits after pltpu.prng_seed.

    # ---- ONE batched prob @ value matmul ------------------------------------
    heads = jnp.einsum('bts,bsd->btd', p.astype(jnp.bfloat16), v,
                       preferred_element_type=jnp.float32)        # (H*Bb, T, hs)

    # ---- back to (Bb*T, H*hs) with head-major columns (matches Wo rows) -----
    cat = jnp.concatenate(
        [heads[h * Bb:(h + 1) * Bb].reshape(Bb * T, hs) for h in range(H)],
        axis=-1)                                                  # (Bb*T, C)

    # ---- output projection + bias (bias / store stay f32) -------------------
    out = jnp.dot(cat.astype(jnp.bfloat16), wo_ref[...],
                  preferred_element_type=jnp.float32) + bo_ref[...]
    # NOTE: C=32 < 128 lanes so this store is masked (vst.msk); at production
    # sizes pack several independent problems along the lane axis instead.
    o_ref[...] = out.astype(o_ref.dtype)


# ---------------------------------------------------------------------------
# One-time parameter preprocessing (hoisted out of the per-call path):
#   - folds the reference's C**-0.5 attention scale into Wq,
#   - packs per-head Q/K/V weights head-major into one (C, 3*H*hs) matrix so
#     the kernel runs a single fused QKV matmul with contiguous head slices,
#   - casts MXU operands to bf16 (softmax / bias math stays f32 in-kernel).
# ---------------------------------------------------------------------------
def pack_mha_params(wq, wk, wv, wo, bo):
    H, C, hs = wq.shape
    scale = jnp.float32(C) ** -0.5                 # reference scales by n_embd

    def stack(w):                                  # (H, C, hs) -> (C, H*hs)
        return jnp.transpose(w, (1, 0, 2)).reshape(C, H * hs)

    wqkv = jnp.concatenate(
        [stack(wq.astype(jnp.float32) * scale), stack(wk), stack(wv)], axis=-1)
    return (wqkv.astype(jnp.bfloat16),
            wo.astype(jnp.bfloat16),
            bo.astype(jnp.float32))


def multi_head_attention(x, wqkv, wo, bo, *, num_heads=NUM_HEADS):
    """x: (B, T, C) f32; wqkv: (C, 3*C) bf16 packed; wo: (C, C) bf16; bo: (1, C) f32."""
    B, T, C = x.shape
    H = num_heads
    hs = C // H

    # Sequences per grid step: fill MXU rows (target ~256) while keeping a real
    # parallel grid axis so large batches shard across TensorCores (v7x) and
    # row tiles get double-buffered BlockSpec pipelining against HBM.
    seqs = max(1, min(B, 256 // T))
    while B % seqs:
        seqs -= 1
    rows = seqs * T
    grid = (B // seqs,)

    x2 = x.reshape(B * T, C)

    kernel = functools.partial(_mha_kernel, seqs=seqs, seq=T,
                               num_heads=H, head_size=hs)

    out2 = pl.pallas_call(
        kernel,
        out_shape=jax.ShapeDtypeStruct((B * T, C), x.dtype),
        grid=grid,
        in_specs=[
            pl.BlockSpec((rows, C), lambda i: (i, 0)),        # row tile of x
            pl.BlockSpec((C, 3 * C), lambda i: (0, 0)),       # resident Wqkv
            pl.BlockSpec((C, C), lambda i: (0, 0)),           # resident Wo
            pl.BlockSpec((1, C), lambda i: (0, 0)),           # resident bias
        ],
        out_specs=pl.BlockSpec((rows, C), lambda i: (i, 0)),
        compiler_params=pltpu.CompilerParams(
            dimension_semantics=("parallel",)),
    )(x2, wqkv, wo, bo)

    return out2.reshape(B, T, C)


# ---------------------------------------------------------------------------
# pure-JAX reference (mirrors the PyTorch forward exactly, eval-mode dropout)
# ---------------------------------------------------------------------------
def reference_mha(x, wq, wk, wv, wo, bo):
    B, T, C = x.shape
    scale = C ** (-0.5)
    mask = jnp.tril(jnp.ones((T, T), dtype=bool))
    heads = []
    for h in range(wq.shape[0]):
        q = x @ wq[h]
        k = x @ wk[h]
        v = x @ wv[h]
        wei = (q @ jnp.swapaxes(k, -2, -1)) * scale
        wei = jnp.where(mask, wei, -jnp.inf)
        wei = jax.nn.softmax(wei, axis=-1)
        heads.append(wei @ v)
    cat = jnp.concatenate(heads, axis=-1)
    return cat @ wo + bo


if __name__ == "__main__":
    key = jax.random.PRNGKey(0)
    kx, kq, kk, kv, kw, kb = jax.random.split(key, 6)

    B, T, C, H = BATCH, BLOCK_SIZE, N_EMBD, NUM_HEADS
    hs = C // H

    x = jax.random.normal(kx, (B, T, C), dtype=jnp.float32)
    # deterministic parameter init (synthetic, not a checkpoint load)
    wq = jax.random.normal(kq, (H, C, hs), dtype=jnp.float32) * 0.1
    wk = jax.random.normal(kk, (H, C, hs), dtype=jnp.float32) * 0.1
    wv = jax.random.normal(kv, (H, C, hs), dtype=jnp.float32) * 0.1
    wo = jax.random.normal(kw, (C, C), dtype=jnp.float32) * 0.1
    bo = jax.random.normal(kb, (1, C), dtype=jnp.float32) * 0.1

    # one-time parameter packing — NOT in the per-call path
    wqkv_p, wo_p, bo_p = pack_mha_params(wq, wk, wv, wo, bo)

    out = multi_head_attention(x, wqkv_p, wo_p, bo_p, num_heads=H)
    out = jax.block_until_ready(out)

    ref = reference_mha(x, wq, wk, wv, wo, bo)
    assert out.shape == (B, T, C)
    # tolerance covers bf16 MXU operands vs the f32 reference
    assert jnp.allclose(out, ref, atol=3e-2, rtol=3e-2), "mismatch vs reference"

    print("KERNEL_OK")
</pallas_src>

<mosaic_0001>
module attributes {stable_mosaic.version = 11 : i64} {
  func.func @_mha_kernel(%arg0: i32, %arg1: memref<16x32xf32, #tpu.memory_space<vmem>>, %arg2: memref<32x96xbf16, #tpu.memory_space<vmem>>, %arg3: memref<32x32xbf16, #tpu.memory_space<vmem>>, %arg4: memref<1x32xf32, #tpu.memory_space<vmem>>, %arg5: memref<16x32xf32, #tpu.memory_space<vmem>>) attributes {dimension_semantics = [#tpu.dimension_semantics<parallel>], iteration_bounds = array<i64: 1>, scalar_prefetch = 0 : i64, scratch_operands = 0 : i64, tpu.core_type = #tpu.core_type<tc>, window_params = [{transform_indices = @transform_0, window_bounds = array<i64: 16, 32>}, {pipeline_mode = #tpu.pipeline_mode<synchronous>, transform_indices = @transform_1, window_bounds = array<i64: 32, 96>}, {pipeline_mode = #tpu.pipeline_mode<synchronous>, transform_indices = @transform_2, window_bounds = array<i64: 32, 32>}, {pipeline_mode = #tpu.pipeline_mode<synchronous>, transform_indices = @transform_3, window_bounds = array<i64: 1, 32>}, {transform_indices = @transform_4, window_bounds = array<i64: 16, 32>}]} {
    %c0 = arith.constant 0 : index
    %c0_0 = arith.constant 0 : index
    %0 = vector.load %arg1[%c0, %c0_0] : memref<16x32xf32, #tpu.memory_space<vmem>>, vector<16x32xf32>
    %1 = arith.truncf %0 : vector<16x32xf32> to vector<16x32xbf16>
    %c0_1 = arith.constant 0 : index
    %c0_2 = arith.constant 0 : index
    %2 = vector.load %arg2[%c0_1, %c0_2] : memref<32x96xbf16, #tpu.memory_space<vmem>>, vector<32x96xbf16>
    %cst = arith.constant dense<0.000000e+00> : vector<16x96xf32>
    %3 = tpu.matmul %1, %2, %cst {dimension_numbers = #tpu.dot_dimension_numbers<[1], [0], [0], [1], [0, 0, 1, 1], [], []>} : vector<16x32xbf16>, vector<32x96xbf16>, vector<16x96xf32> -> vector<16x96xf32>
    %4 = vector.extract_strided_slice %3 {offsets = [0, 0], sizes = [16, 8], strides = [1, 1]} : vector<16x96xf32> to vector<16x8xf32>
    %5 = vector.shape_cast %4 : vector<16x8xf32> to vector<2x8x8xf32>
    %6 = vector.extract_strided_slice %3 {offsets = [0, 8], sizes = [16, 8], strides = [1, 1]} : vector<16x96xf32> to vector<16x8xf32>
    %7 = vector.shape_cast %6 : vector<16x8xf32> to vector<2x8x8xf32>
    %8 = vector.extract_strided_slice %3 {offsets = [0, 16], sizes = [16, 8], strides = [1, 1]} : vector<16x96xf32> to vector<16x8xf32>
    %9 = vector.shape_cast %8 : vector<16x8xf32> to vector<2x8x8xf32>
    %10 = vector.extract_strided_slice %3 {offsets = [0, 24], sizes = [16, 8], strides = [1, 1]} : vector<16x96xf32> to vector<16x8xf32>
    %11 = vector.shape_cast %10 : vector<16x8xf32> to vector<2x8x8xf32>
    %12 = tpu.concatenate %5, %7, %9, %11 in 0 : vector<2x8x8xf32>, vector<2x8x8xf32>, vector<2x8x8xf32>, vector<2x8x8xf32> -> vector<8x8x8xf32>
    %13 = arith.truncf %12 : vector<8x8x8xf32> to vector<8x8x8xbf16>
    %14 = vector.extract_strided_slice %3 {offsets = [0, 32], sizes = [16, 8], strides = [1, 1]} : vector<16x96xf32> to vector<16x8xf32>
    %15 = vector.shape_cast %14 : vector<16x8xf32> to vector<2x8x8xf32>
    %16 = vector.extract_strided_slice %3 {offsets = [0, 40], sizes = [16, 8], strides = [1, 1]} : vector<16x96xf32> to vector<16x8xf32>
    %17 = vector.shape_cast %16 : vector<16x8xf32> to vector<2x8x8xf32>
    %18 = vector.extract_strided_slice %3 {offsets = [0, 48], sizes = [16, 8], strides = [1, 1]} : vector<16x96xf32> to vector<16x8xf32>
    %19 = vector.shape_cast %18 : vector<16x8xf32> to vector<2x8x8xf32>
    %20 = vector.extract_strided_slice %3 {offsets = [0, 56], sizes = [16, 8], strides = [1, 1]} : vector<16x96xf32> to vector<16x8xf32>
    %21 = vector.shape_cast %20 : vector<16x8xf32> to vector<2x8x8xf32>
    %22 = tpu.concatenate %15, %17, %19, %21 in 0 : vector<2x8x8xf32>, vector<2x8x8xf32>, vector<2x8x8xf32>, vector<2x8x8xf32> -> vector<8x8x8xf32>
    %23 = arith.truncf %22 : vector<8x8x8xf32> to vector<8x8x8xbf16>
    %24 = vector.extract_strided_slice %3 {offsets = [0, 64], sizes = [16, 8], strides = [1, 1]} : vector<16x96xf32> to vector<16x8xf32>
    %25 = vector.shape_cast %24 : vector<16x8xf32> to vector<2x8x8xf32>
    %26 = vector.extract_strided_slice %3 {offsets = [0, 72], sizes = [16, 8], strides = [1, 1]} : vector<16x96xf32> to vector<16x8xf32>
    %27 = vector.shape_cast %26 : vector<16x8xf32> to vector<2x8x8xf32>
    %28 = vector.extract_strided_slice %3 {offsets = [0, 80], sizes = [16, 8], strides = [1, 1]} : vector<16x96xf32> to vector<16x8xf32>
    %29 = vector.shape_cast %28 : vector<16x8xf32> to vector<2x8x8xf32>
    %30 = vector.extract_strided_slice %3 {offsets = [0, 88], sizes = [16, 8], strides = [1, 1]} : vector<16x96xf32> to vector<16x8xf32>
    %31 = vector.shape_cast %30 : vector<16x8xf32> to vector<2x8x8xf32>
    %32 = tpu.concatenate %25, %27, %29, %31 in 0 : vector<2x8x8xf32>, vector<2x8x8xf32>, vector<2x8x8xf32>, vector<2x8x8xf32> -> vector<8x8x8xf32>
    %33 = arith.truncf %32 : vector<8x8x8xf32> to vector<8x8x8xbf16>
    "tpu.trace_start"() <{level = 10 : i32, message = "btd,bsd->bts"}> : () -> ()
    %cst_3 = arith.constant dense<0.000000e+00> : vector<8x8x8xf32>
    %34 = tpu.matmul %13, %23, %cst_3 {dimension_numbers = #tpu.dot_dimension_numbers<[2], [2], [1], [1], [0, 0, 0, 1, 1, 1], [0], [0]>} : vector<8x8x8xbf16>, vector<8x8x8xbf16>, vector<8x8x8xf32> -> vector<8x8x8xf32>
    "tpu.trace_stop"() : () -> ()
    %35 = tpu.iota {dimensions = array<i32: 0>} : vector<8x8xi32>
    %36 = tpu.iota {dimensions = array<i32: 1>} : vector<8x8xi32>
    %37 = arith.cmpi sle, %36, %35 : vector<8x8xi32>
    %38 = vector.shape_cast %37 : vector<8x8xi1> to vector<1x8x8xi1>
    %cst_4 = arith.constant -1.000000e+30 : f32
    %39 = vector.shape_cast %38 : vector<1x8x8xi1> to vector<1x8x8xi1>
    %40 = vector.broadcast %39 : vector<1x8x8xi1> to vector<8x8x8xi1>
    %41 = vector.broadcast %cst_4 : f32 to vector<8x8x8xf32>
    %42 = arith.select %40, %34, %41 : vector<8x8x8xi1>, vector<8x8x8xf32>
    %cst_5 = arith.constant dense<0xFF800000> : vector<8x8xf32>
    %43 = vector.multi_reduction <maximumf>, %42, %cst_5 [2] : vector<8x8x8xf32> to vector<8x8xf32>
    %44 = vector.shape_cast %43 : vector<8x8xf32> to vector<8x8x1xf32>
    %45 = vector.broadcast %44 : vector<8x8x1xf32> to vector<8x8x8xf32>
    %46 = arith.subf %42, %45 : vector<8x8x8xf32>
    %47 = math.exp %46 : vector<8x8x8xf32>
    %cst_6 = arith.constant dense<0.000000e+00> : vector<8x8xf32>
    %48 = vector.multi_reduction <add>, %47, %cst_6 [2] : vector<8x8x8xf32> to vector<8x8xf32>
    %49 = vector.shape_cast %48 : vector<8x8xf32> to vector<8x8x1xf32>
    %50 = tpu.reciprocal %49 : vector<8x8x1xf32> -> vector<8x8x1xf32>
    %51 = vector.broadcast %50 : vector<8x8x1xf32> to vector<8x8x8xf32>
    %52 = arith.mulf %47, %51 : vector<8x8x8xf32>
    %53 = arith.truncf %52 : vector<8x8x8xf32> to vector<8x8x8xbf16>
    "tpu.trace_start"() <{level = 10 : i32, message = "bts,bsd->btd"}> : () -> ()
    %cst_7 = arith.constant dense<0.000000e+00> : vector<8x8x8xf32>
    %54 = tpu.matmul %53, %33, %cst_7 {dimension_numbers = #tpu.dot_dimension_numbers<[2], [1], [1], [2], [0, 0, 0, 1, 1, 2], [0], [0]>} : vector<8x8x8xbf16>, vector<8x8x8xbf16>, vector<8x8x8xf32> -> vector<8x8x8xf32>
    "tpu.trace_stop"() : () -> ()
    %55 = vector.extract_strided_slice %54 {offsets = [0, 0, 0], sizes = [2, 8, 8], strides = [1, 1, 1]} : vector<8x8x8xf32> to vector<2x8x8xf32>
    %56 = vector.shape_cast %55 : vector<2x8x8xf32> to vector<16x8xf32>
    %57 = vector.extract_strided_slice %54 {offsets = [2, 0, 0], sizes = [2, 8, 8], strides = [1, 1, 1]} : vector<8x8x8xf32> to vector<2x8x8xf32>
    %58 = vector.shape_cast %57 : vector<2x8x8xf32> to vector<16x8xf32>
    %59 = vector.extract_strided_slice %54 {offsets = [4, 0, 0], sizes = [2, 8, 8], strides = [1, 1, 1]} : vector<8x8x8xf32> to vector<2x8x8xf32>
    %60 = vector.shape_cast %59 : vector<2x8x8xf32> to vector<16x8xf32>
    %61 = vector.extract_strided_slice %54 {offsets = [6, 0, 0], sizes = [2, 8, 8], strides = [1, 1, 1]} : vector<8x8x8xf32> to vector<2x8x8xf32>
    %62 = vector.shape_cast %61 : vector<2x8x8xf32> to vector<16x8xf32>
    %63 = tpu.concatenate %56, %58, %60, %62 in 1 : vector<16x8xf32>, vector<16x8xf32>, vector<16x8xf32>, vector<16x8xf32> -> vector<16x32xf32>
    %64 = arith.truncf %63 : vector<16x32xf32> to vector<16x32xbf16>
    %c0_8 = arith.constant 0 : index
    %c0_9 = arith.constant 0 : index
    %65 = vector.load %arg3[%c0_8, %c0_9] : memref<32x32xbf16, #tpu.memory_space<vmem>>, vector<32x32xbf16>
    %cst_10 = arith.constant dense<0.000000e+00> : vector<16x32xf32>
    %66 = tpu.matmul %64, %65, %cst_10 {dimension_numbers = #tpu.dot_dimension_numbers<[1], [0], [0], [1], [0, 0, 1, 1], [], []>} : vector<16x32xbf16>, vector<32x32xbf16>, vector<16x32xf32> -> vector<16x32xf32>
    %c0_11 = arith.constant 0 : index
    %c0_12 = arith.constant 0 : index
    %67 = vector.load %arg4[%c0_11, %c0_12] : memref<1x32xf32, #tpu.memory_space<vmem>>, vector<1x32xf32>
    %68 = vector.broadcast %67 : vector<1x32xf32> to vector<16x32xf32>
    %69 = arith.addf %66, %68 : vector<16x32xf32>
    %c0_13 = arith.constant 0 : index
    %c0_14 = arith.constant 0 : index
    %70 = vector.load %arg5[%c0_13, %c0_14] : memref<16x32xf32, #tpu.memory_space<vmem>>, vector<16x32xf32>
    tpu.vector_store %arg5[%c0_13, %c0_14], %69 {strides = array<i32>} : memref<16x32xf32, #tpu.memory_space<vmem>>, vector<16x32xf32>,
    return
  }
  func.func @transform_0(%arg0: i32) -> (i32, i32) {
    %c0_i32 = arith.constant 0 : i32
    %c0_i32_0 = arith.constant 0 : i32
    return %arg0, %c0_i32 : i32, i32
  }
  func.func @transform_1(%arg0: i32) -> (i32, i32) {
    %c0_i32 = arith.constant 0 : i32
    %c0_i32_0 = arith.constant 0 : i32
    %c0_i32_1 = arith.constant 0 : i32
    return %c0_i32, %c0_i32_0 : i32, i32
  }
  func.func @transform_2(%arg0: i32) -> (i32, i32) {
    %c0_i32 = arith.constant 0 : i32
    %c0_i32_0 = arith.constant 0 : i32
    %c0_i32_1 = arith.constant 0 : i32
    return %c0_i32, %c0_i32_0 : i32, i32
  }
  func.func @transform_3(%arg0: i32) -> (i32, i32) {
    %c0_i32 = arith.constant 0 : i32
    %c0_i32_0 = arith.constant 0 : i32
    %c0_i32_1 = arith.constant 0 : i32
    return %c0_i32, %c0_i32_0 : i32, i32
  }
  func.func @transform_4(%arg0: i32) -> (i32, i32) {
    %c0_i32 = arith.constant 0 : i32
    %c0_i32_0 = arith.constant 0 : i32
    return %arg0, %c0_i32 : i32, i32
  }
}

</mosaic_0001>

<bundles_post_ra>
// kernel: tpu_custom_call.1
= control target key start
LH: loop header
LB: loop body
LE: loop exit
PB: predicated region body
PF: predicated region fallthrough
CT: control target
= control target key end

     0   :  { %9 = vsyncpa [#allocation3], 0  ;;  %s1823_s0 = inlined_call_operand.hbm [shape: f32[16,32], index: 0, kind: input, shape index: {}]   ;;  %s1824_s1 = inlined_call_operand.hbm [shape: bf16[32,96], index: 1, kind: input, shape index: {}]   ;;  %s1825_s2 = inlined_call_operand.hbm [shape: bf16[32,32], index: 2, kind: input, shape index: {}]   ;;  %s1826_s3 = inlined_call_operand.vmem [shape: f32[1,32], index: 3, kind: input, shape index: {}]   ;;  %s1827_s4 = inlined_call_operand.hbm [shape: f32[16,32], index: 4, kind: output, shape index: {}]  }
   0x1   :  { %10 = vsyncpa [#allocation6], 0 }
   0x2   :  { %11 = vsyncpa [#allocation4], 0  ;;  %s1510_s15 = smov [#allocation5]   ;;  %s1416_s19 = scalar_lea.hbm %s1824_s1, 256 }
   0x3   :  { %s29_s16 = sshll.u32 %s1510_s15, 4  ;;  %p1417_p0 = scmp.ne.s32.totalorder %s1824_s1, %s1416_s19  ;;  %s30_s16 = int_to_ptr.vmem [resolvable:$true] %s29_s16 }
   0x4   :  { %p1420_p1 = scmp.lt.u32.totalorder %s1416_s19, %s1824_s1 }
   0x6   :  { %p1422_p2 = pnand %p1420_p1, %p1417_p0 }
   0x8   :  { %1425 = shalt.err (!%p1422_p2)
}
   0x9   :  { %s1426_s24 = scalar_lea.vmem %s30_s16, 256  ;;  %p1431_p4 = scmp.lt.s32.totalorder %s30_s16, %s30_s16 }
   0xa   :  { %p1427_p3 = scmp.ne.s32.totalorder %s30_s16, %s1426_s24  ;;  %p1432_p5 = scmp.lt.s32.totalorder %s1426_s24, %s1426_s24 }
   0xc   :  { %p1433_p6 = por %p1432_p5, %p1431_p4 }
   0xe   :  { %p1434_p7 = pnand %p1433_p6, %p1427_p3 }
  0x10   :  { %1437 = shalt.err (!%p1434_p7)
}
  0x11   :  { %s1511_s25 = smov 64   ;;  %s1512_s26 = smov 4  }
  0x12   :  { %35 = dma.hbm_to_vmem [thread:$0]  %s1824_s1, 256, %s30_s16, [#allocation6], %s1511_s25, %s1511_s25, %s1512_s26  }
  0x13   :  { %s1513_s29 = smov [#allocation2]   ;;  %s1438_s7 = scalar_lea.hbm %s1823_s0, 256 }
  0x14   :  { %s17_s30 = sshll.u32 %s1513_s29, 4  ;;  %p1439_p8 = scmp.ne.s32.totalorder %s1823_s0, %s1438_s7  ;;  %s18_s30 = int_to_ptr.vmem [resolvable:$true] %s17_s30 }
  0x15   :  { %p1442_p9 = scmp.lt.u32.totalorder %s1438_s7, %s1823_s0 }
  0x17   :  { %p1444_p10 = pnand %p1442_p9, %p1439_p8 }
  0x19   :  { %1447 = shalt.err (!%p1444_p10)
}
  0x1a   :  { %s1448_s12 = scalar_lea.vmem %s18_s30, 256  ;;  %p1453_p12 = scmp.lt.s32.totalorder %s18_s30, %s18_s30 }
  0x1b   :  { %p1449_p11 = scmp.ne.s32.totalorder %s18_s30, %s1448_s12  ;;  %p1454_p13 = scmp.lt.s32.totalorder %s1448_s12, %s1448_s12 }
  0x1d   :  { %p1455_p0 = por %p1454_p13, %p1453_p12 }
  0x1f   :  { %p1456_p1 = pnand %p1455_p0, %p1449_p11 }
  0x21   :  { %1459 = shalt.err (!%p1456_p1)
}
  0x22   :  { %s1514_s1 = smov 128   ;;  %s1515_s13 = smov 8  }
  0x23   :  { %23 = dma.hbm_to_vmem [thread:$0]  %s1823_s0, 256, %s18_s30, [#allocation3], %s1514_s1, %s1514_s1, %s1515_s13  }
  0x24   :  { %s1516_s16 = smov [#allocation7]   ;;  %s1460_s20 = scalar_lea.hbm %s1825_s2, 256 }
  0x25   :  { %s41_s17 = sshll.u32 %s1516_s16, 4  ;;  %p1461_p2 = scmp.ne.s32.totalorder %s1825_s2, %s1460_s20  ;;  %s42_s17 = int_to_ptr.vmem [resolvable:$true] %s41_s17 }
  0x26   :  { %p1464_p3 = scmp.lt.u32.totalorder %s1460_s20, %s1825_s2 }
  0x28   :  { %p1466_p4 = pnand %p1464_p3, %p1461_p2 }
  0x2a   :  { %1469 = shalt.err (!%p1466_p4)
}
  0x2b   :  { %s1470_s27 = scalar_lea.vmem %s42_s17, 256  ;;  %p1475_p6 = scmp.lt.s32.totalorder %s42_s17, %s42_s17 }
  0x2c   :  { %p1471_p5 = scmp.ne.s32.totalorder %s42_s17, %s1470_s27  ;;  %p1476_p7 = scmp.lt.s32.totalorder %s1470_s27, %s1470_s27 }
  0x2e   :  { %p1477_p8 = por %p1476_p7, %p1475_p6 }
  0x30   :  { %p1478_p9 = pnand %p1477_p8, %p1471_p5 }
  0x32   :  { %1481 = shalt.err (!%p1478_p9)
}
  0x33   :  { %47 = dma.hbm_to_vmem [thread:$0]  %s1825_s2, 256, %s42_s17, [#allocation6], %s1511_s25, %s1511_s25, %s1512_s26  }
  0x34   :  { %1504 = dma.done.wait [#allocation3], 256  }
  0x35   :  { %1505 = vsyncadd [#allocation3], 4294967040 }
  0x36   :  { %1506 = dma.done.wait [#allocation6], 512  }
  0x37   :  { %1507 = vsyncadd [#allocation6], 4294966784  ;;  %v1517_v0 = vmov 0.0   ;;  %vm1518_vm0 = vmmov 0   ;;  %v1380_v1 = vld [vmem:[#allocation5] sm:$0xff]   ;;  %v1381_v2 = vld [vmem:[#allocation5 + $0x8] sm:$0xff]   ;;  %v545_v48 = vlaneseq }
  0x38   :  { %1222 = vmatprep.subr.bf16.mxu0 %v1517_v0  ;;  %1226 = vmatprep.mubr.msk.bf16.mxu0 %vm1518_vm0, %v1517_v0  ;;  %v60_v3 = vld [vmem:[#allocation2] sm:$0xff]  ;;  %v61_v4 = vld [vmem:[#allocation2 + $0x8] sm:$0xff]  ;;  %vm79_vm1 = vcmask 261120   ;;  %s1519_s2 = smov 104   ;;  %s1520_s26 = smov 120   ;;  %vm155_vm2 = vcmask 64512  }
  0x39   :  { %1230 = vmatprep.subr.bf16.mxu1 %v1517_v0  ;;  %1232 = vmatprep.mubr.msk.bf16.mxu1 %vm1518_vm0, %v1517_v0  ;;  %v62_v5 = vpack.c.bf16 %v61_v4, %v60_v3  ;;  %s1521_s29 = smov 96   ;;  %s1522_s30 = smov 112   ;;  %vm661_vm3 = vcmask 1043456   ;;  %v546_v49 = vshrl.u32 %v545_v48, 7  ;;  %v548_v50 = vand.u32 127, %v545_v48 }
  0x3a   :  { %1223 = vmatpush3.bf16.msra.mxu0 %v1380_v1  ;;  %s1524_s5 = smov 24   ;;  %vm1067_vm5 = vcmask 130048   ;;  %vm1070_vm6 = vcmask 195584   ;;  %s1525_s8 = smov [#allocation8]  }
  0x3b   :  { %1224 = vmatprep.subr.bf16.mxu0 %v1517_v0  ;;  %vm1685_vm4 = vcmp.le.s32.totalorder %v548_v50, %v546_v49  ;;  %s1148_s9 = sshll.u32 %s1525_s8, 4  ;;  %s1149_s9 = int_to_ptr.vmem [resolvable:$true] %s1148_s9 }
  0x3c   :  { %s1482_s10 = scalar_lea.vmem %s1149_s9, 256  ;;  %p1487_p11 = scmp.lt.s32.totalorder %s1149_s9, %s1149_s9 }
  0x3d   :  { %p1483_p10 = scmp.ne.s32.totalorder %s1149_s9, %s1482_s10  ;;  %p1488_p12 = scmp.lt.s32.totalorder %s1482_s10, %s1482_s10 }
  0x3e   :  { %1225 = vmatpush3.bf16.msra.mxu0 %v1381_v2 }
  0x3f   :  { %1236 = vmatprep.subr.bf16.mxu0 %v1517_v0  ;;  %p1489_p13 = por %p1488_p12, %p1487_p11 }
  0x41   :  { %1227 = vmatmul.mubr.msk.bf16.vlgmr.msra.gmra.mrb[0].mxu0 %vm79_vm1, %v62_v5  ;;  %p1490_p0 = pnand %p1489_p13, %p1483_p10 }
  0x42   :  { %1238 = vmatprep.mubr.msk.bf16.mxu0 %vm1518_vm0, %v1517_v0 }
 0x114   :  { %v117_v6 = vpop.f32.mrb[0].mxu0 }
 0x115   :  { %v1228_v7 = vpop.f32.mrb[1].mxu0  ;;  %v144_v11 = vpack.c.bf16 %v117_v6, %v117_v6 }
 0x116   :  { %v120_v8 = vpop.f32.mrb[2].mxu0 }
 0x117   :  { %v1229_v9 = vpop.f32.mrb[3].mxu0  ;;  %v1360_v10 = vpack.i.bf16 %v120_v8, %v117_v6  ;;  %v145_v12 = vpack.c.bf16 %v120_v8, %v120_v8 }
 0x119   :  { %1361 = vrot.lane.b32.xlu1 %v1360_v10, %s1519_s2  ;;  %1351 = vrot.lane.b32.xlu0 %v1360_v10, %s1520_s26 }
 0x11d   :  { %153 = vrot.lane.b32.xlu1 %v144_v11, %s1521_s29  ;;  %1356 = vrot.lane.b32.xlu0 %v1360_v10, %s1522_s30 }
 0x121   :  { %203 = vrot.lane.b32.xlu0 %v145_v12, %s1521_s29 }
 0x18b   :  { %v1362_v13 = vpop.permute.xlu1 %1361  ;;  %v1352_v14 = vpop.permute.xlu0 %1351 }
 0x18c   :  { %v1354_v15 = vunpack.i.h.bf16 %v1352_v14  ;;  %v1353_v16 = vunpack.i.l.bf16 %v1352_v14  ;;  %v1363_v24 = vunpack.i.l.bf16 %v1362_v13  ;;  %v1364_v27 = vunpack.i.h.bf16 %v1362_v13 }
 0x18e   :  { %v1609_v17 = vpack.c.bf16 %v1354_v15, %v1354_v15  ;;  %v1611_v18 = vpack.c.bf16 %v1353_v16, %v1353_v16  ;;  %v1628_v30 = vpack.c.bf16 %v1363_v24, %v1363_v24  ;;  %v1631_v31 = vpack.c.bf16 %v1364_v27, %v1364_v27 }
 0x18f   :  { %v154_v19 = vpop.permute.xlu1 %153  ;;  %v1357_v20 = vpop.permute.xlu0 %1356 }
 0x190   :  { %v1359_v21 = vunpack.i.h.bf16 %v1357_v20  ;;  %v1358_v22 = vunpack.i.l.bf16 %v1357_v20  ;;  %252 = vrot.lane.b32.xlu1 %v1611_v18, %s1521_s29  ;;  %301 = vrot.lane.b32.xlu0 %v1609_v17, %s1521_s29  ;;  %v160_v23 = vsel %vm155_vm2, %v154_v19, 0 }
 0x191   :  { %1231 = vmatpush3.bf16.xpose.msra.mxu1 %v160_v23 }
 0x192   :  { %v1618_v25 = vpack.c.bf16 %v1359_v21, %v1359_v21  ;;  %v1620_v26 = vpack.c.bf16 %v1358_v22, %v1358_v22  ;;  %1242 = vmatprep.subr.bf16.mxu1 %v1517_v0 }
 0x193   :  { %v204_v28 = vpop.permute.xlu0 %203 }
 0x194   :  { %v209_v29 = vsel %vm155_vm2, %v204_v28, 0  ;;  %350 = vrot.lane.b32.xlu1 %v1620_v26, %s1521_s29  ;;  %399 = vrot.lane.b32.xlu0 %v1618_v25, %s1521_s29 }
 0x195   :  { %1237 = vmatpush3.bf16.xpose.msra.mxu0 %v209_v29 }
 0x196   :  { %1248 = vmatprep.subr.bf16.mxu0 %v1517_v0 }
 0x198   :  { %1233 = vmatmul.mubr.msk.bf16.vlgmr.msra.gmra.mrb[0].mxu1 %vm155_vm2, %v144_v11  ;;  %448 = vrot.lane.b32.xlu1 %v1628_v30, %s1521_s29 }
 0x199   :  { %497 = vrot.lane.b32.xlu0 %v1631_v31, %s1521_s29  ;;  %1244 = vmatprep.mubr.msk.bf16.mxu1 %vm1518_vm0, %v1517_v0 }
 0x19c   :  { %705 = vrot.lane.b32.xlu1 %v145_v12, %s1511_s25  ;;  %1239 = vmatmul.mubr.msk.bf16.vlgmr.msra.gmra.mrb[4].mxu0 %vm155_vm2, %v145_v12 }
 0x19d   :  { %656 = vrot.lane.b32.xlu0 %v144_v11, %s1511_s25  ;;  %1250 = vmatprep.mubr.msk.bf16.mxu0 %vm1518_vm0, %v1517_v0 }
 0x202   :  { %v253_v32 = vpop.permute.xlu1 %252  ;;  %v302_v33 = vpop.permute.xlu0 %301 }
 0x203   :  { %v258_v34 = vsel %vm155_vm2, %v253_v32, 0  ;;  %v307_v35 = vsel %vm155_vm2, %v302_v33, 0 }
 0x204   :  { %1243 = vmatpush3.bf16.xpose.msra.mxu1 %v258_v34  ;;  %1249 = vmatpush3.bf16.xpose.msra.mxu0 %v307_v35 }
 0x205   :  { %1254 = vmatprep.subr.bf16.mxu1 %v1517_v0  ;;  %1260 = vmatprep.subr.bf16.mxu0 %v1517_v0 }
 0x206   :  { %v351_v36 = vpop.permute.xlu1 %350  ;;  %v400_v37 = vpop.permute.xlu0 %399 }
 0x207   :  { %v356_v38 = vsel %vm155_vm2, %v351_v36, 0  ;;  %v405_v39 = vsel %vm155_vm2, %v400_v37, 0 }
 0x20a   :  { %v449_v40 = vpop.permute.xlu1 %448 }
 0x20b   :  { %1245 = vmatmul.mubr.msk.bf16.vlgmr.msra.gmra.mrb[4].mxu1 %vm155_vm2, %v1611_v18  ;;  %1251 = vmatmul.mubr.msk.bf16.vlgmr.msra.gmra.mrb[8].mxu0 %vm155_vm2, %v1609_v17  ;;  %v498_v41 = vpop.permute.xlu0 %497  ;;  %v454_v42 = vsel %vm155_vm2, %v449_v40, 0 }
 0x20c   :  { %1255 = vmatpush3.bf16.xpose.msra.mxu1 %v356_v38  ;;  %1261 = vmatpush3.bf16.xpose.msra.mxu0 %v405_v39  ;;  %v503_v43 = vsel %vm155_vm2, %v498_v41, 0 }
 0x20d   :  { %1256 = vmatprep.mubr.msk.bf16.mxu1 %vm1518_vm0, %v1517_v0  ;;  %1262 = vmatprep.mubr.msk.bf16.mxu0 %vm1518_vm0, %v1517_v0 }
 0x20e   :  { %1266 = vmatprep.subr.bf16.mxu1 %v1517_v0  ;;  %1272 = vmatprep.subr.bf16.mxu0 %v1517_v0  ;;  %v706_v44 = vpop.permute.xlu1 %705 }
 0x20f   :  { %v657_v45 = vpop.permute.xlu0 %656  ;;  %v711_v46 = vsel %vm661_vm3, %v706_v44, 0 }
 0x210   :  { %v663_v47 = vsel %vm661_vm3, %v657_v45, 0 }
 0x213   :  { %1257 = vmatmul.mubr.msk.bf16.vlgmr.msra.gmra.mrb[8].mxu1 %vm155_vm2, %v1620_v26  ;;  %1263 = vmatmul.mubr.msk.bf16.vlgmr.msra.gmra.mrb[12].mxu0 %vm155_vm2, %v1618_v25 }
 0x214   :  { %1267 = vmatpush3.bf16.xpose.msra.mxu1 %v454_v42  ;;  %1273 = vmatpush3.bf16.xpose.msra.mxu0 %v503_v43 }
 0x215   :  { %1268 = vmatprep.mubr.msk.bf16.mxu1 %vm1518_vm0, %v1517_v0  ;;  %1274 = vmatprep.mubr.msk.bf16.mxu0 %vm1518_vm0, %v1517_v0 }
 0x216   :  { %1278 = vmatprep.subr.bf16.mxu1 %v1517_v0  ;;  %1284 = vmatprep.subr.bf16.mxu0 %v1517_v0 }
 0x21b   :  { %1269 = vmatmul.mubr.msk.bf16.vlgmr.msra.gmra.mrb[12].mxu1 %vm155_vm2, %v1628_v30  ;;  %1275 = vmatmul.mubr.msk.bf16.vlgmr.msra.gmra.mrb[16].mxu0 %vm155_vm2, %v1631_v31 }
 0x21c   :  { %1279 = vmatpush3.bf16.msra.mxu1 %v663_v47  ;;  %1285 = vmatpush3.bf16.msra.mxu0 %v711_v46 }
 0x21d   :  { %1280 = vmatprep.mubr.msk.bf16.mxu1 %vm1518_vm0, %v1517_v0  ;;  %1286 = vmatprep.mubr.msk.bf16.mxu0 %vm1518_vm0, %v1517_v0 }
 0x21e   :  { %1290 = vmatprep.subr.bf16.mxu1 %v1517_v0  ;;  %1296 = vmatprep.subr.bf16.mxu0 %v1517_v0 }
 0x26b   :  { %v196_v52 = vpop.f32.mrb[0].mxu1 }
 0x26c   :  { %v552_v53 = vsel %vm1685_vm4, %v196_v52, -1e+30  ;;  %v1234_v54 = vpop.f32.mrb[1].mxu1 }
 0x26d   :  { %v199_v55 = vpop.f32.mrb[2].mxu1  ;;  %v560_v56 = vsel %vm155_vm2, %v552_v53, -inf }
 0x26e   :  { %v1235_v57 = vpop.f32.mrb[3].mxu1  ;;  %561 = vmax.xlane.f32.xlu1 %v560_v56 }
 0x26f   :  { %v245_v58 = vpop.f32.mrb[4].mxu0 }
 0x270   :  { %v553_v59 = vsel %vm1685_vm4, %v245_v58, -1e+30  ;;  %v1240_v60 = vpop.f32.mrb[5].mxu0 }
 0x271   :  { %v248_v61 = vpop.f32.mrb[6].mxu0  ;;  %v563_v62 = vsel %vm155_vm2, %v553_v59, -inf }
 0x272   :  { %564 = vmax.xlane.f32.xlu0 %v563_v62  ;;  %v1241_v63 = vpop.f32.mrb[7].mxu0 }
 0x2de   :  { %v294_v1 = vpop.f32.mrb[4].mxu1  ;;  %v343_v2 = vpop.f32.mrb[8].mxu0 }
 0x2df   :  { %v554_v3 = vsel %vm1685_vm4, %v294_v1, -1e+30  ;;  %v555_v4 = vsel %vm1685_vm4, %v343_v2, -1e+30  ;;  %v1246_v5 = vpop.f32.mrb[5].mxu1  ;;  %v1252_v6 = vpop.f32.mrb[9].mxu0 }
 0x2e0   :  { %v297_v7 = vpop.f32.mrb[6].mxu1  ;;  %v346_v8 = vpop.f32.mrb[10].mxu0  ;;  %v566_v9 = vsel %vm155_vm2, %v554_v3, -inf  ;;  %v569_v10 = vsel %vm155_vm2, %v555_v4, -inf }
 0x2e1   :  { %v1247_v11 = vpop.f32.mrb[7].mxu1  ;;  %567 = vmax.xlane.f32.xlu0 %v566_v9  ;;  %570 = vmax.xlane.f32.xlu1 %v569_v10  ;;  %v1253_v12 = vpop.f32.mrb[11].mxu0 }
 0x2e6   :  { %v392_v13 = vpop.f32.mrb[8].mxu1  ;;  %v441_v14 = vpop.f32.mrb[12].mxu0 }
 0x2e7   :  { %v1703_v15 = vsel %vm1685_vm4, %v392_v13, -1e+30  ;;  %v557_v16 = vsel %vm1685_vm4, %v441_v14, -1e+30  ;;  %v1258_v19 = vpop.f32.mrb[9].mxu1  ;;  %v1264_v20 = vpop.f32.mrb[13].mxu0 }
 0x2e8   :  { %v395_v21 = vpop.f32.mrb[10].mxu1  ;;  %v444_v22 = vpop.f32.mrb[14].mxu0  ;;  %v572_v23 = vsel %vm155_vm2, %v1703_v15, -inf  ;;  %v575_v24 = vsel %vm155_vm2, %v557_v16, -inf }
 0x2e9   :  { %v1259_v27 = vpop.f32.mrb[11].mxu1  ;;  %573 = vmax.xlane.f32.xlu0 %v572_v23  ;;  %576 = vmax.xlane.f32.xlu1 %v575_v24  ;;  %v1265_v28 = vpop.f32.mrb[15].mxu0 }
 0x2ee   :  { %v490_v29 = vpop.f32.mrb[12].mxu1  ;;  %v539_v32 = vpop.f32.mrb[16].mxu0 }
 0x2ef   :  { %v1712_v33 = vsel %vm1685_vm4, %v490_v29, -1e+30  ;;  %v559_v34 = vsel %vm1685_vm4, %v539_v32, -1e+30  ;;  %v1270_v35 = vpop.f32.mrb[13].mxu1  ;;  %v1276_v36 = vpop.f32.mrb[17].mxu0 }
 0x2f0   :  { %v493_v37 = vpop.f32.mrb[14].mxu1  ;;  %v542_v38 = vpop.f32.mrb[18].mxu0  ;;  %v578_v39 = vsel %vm155_vm2, %v1712_v33, -inf  ;;  %v581_v40 = vsel %vm155_vm2, %v559_v34, -inf }
 0x2f1   :  { %v1271_v41 = vpop.f32.mrb[15].mxu1  ;;  %579 = vmax.xlane.f32.xlu0 %v578_v39  ;;  %582 = vmax.xlane.f32.xlu1 %v581_v40  ;;  %v1277_v42 = vpop.f32.mrb[19].mxu0 }
 0x2fb   :  { %v562_v43 = vpop.xlane.xlu1 %561 }
 0x2fc   :  { %v584_v45 = vsub.f32 %v552_v53, %v562_v43 }
 0x2fe   :  { %v592_v47 = vmul.f32 1.442695, %v584_v45 }
 0x2ff   :  { %v565_v44 = vpop.xlane.xlu0 %564 }
 0x300   :  { %v585_v46 = vsub.f32 %v553_v59, %v565_v44  ;;  %1384 = vpow2.f32 %v592_v47 }
 0x302   :  { %753 = vrot.lane.b32.xlu1 %v1611_v18, %s1511_s25  ;;  %v594_v48 = vmul.f32 1.442695, %v585_v46 }
 0x304   :  { %1386 = vpow2.f32 %v594_v48 }
 0x307   :  { %801 = vrot.lane.b32.xlu0 %v1609_v17, %s1511_s25 }
 0x30a   :  { %v1385_v49 = vpop.eup %1384 }
 0x30b   :  { %v608_v51 = vsel %vm155_vm2, %v1385_v49, 0.0 }
 0x30e   :  { %v1387_v50 = vpop.eup %1386 }
 0x30f   :  { %v611_v52 = vsel %vm155_vm2, %v1387_v50, 0.0 }
 0x326   :  { %609 = vadd.xlane.f32.xlu0 %v608_v51  ;;  %612 = vadd.xlane.f32.xlu1 %v611_v52 }
 0x337   :  { %849 = vrot.lane.b32.xlu1 %v1620_v26, %s1511_s25 }
 0x36e   :  { %v568_v17 = vpop.xlane.xlu0 %567  ;;  %v571_v18 = vpop.xlane.xlu1 %570 }
 0x36f   :  { %v586_v54 = vsub.f32 %v554_v3, %v568_v17  ;;  %v587_v53 = vsub.f32 %v555_v4, %v571_v18 }
 0x371   :  { %v596_v55 = vmul.f32 1.442695, %v586_v54  ;;  %v598_v56 = vmul.f32 1.442695, %v587_v53 }
 0x373   :  { %1388 = vpow2.f32 %v596_v55 }
 0x374   :  { %1390 = vpow2.f32 %v598_v56 }
 0x376   :  { %v577_v57 = vpop.xlane.xlu1 %576  ;;  %v574_v7 = vpop.xlane.xlu0 %573 }
 0x377   :  { %v589_v58 = vsub.f32 %v557_v16, %v577_v57  ;;  %v588_v8 = vsub.f32 %v1703_v15, %v574_v7 }
 0x379   :  { %v602_v59 = vmul.f32 1.442695, %v589_v58  ;;  %v600_v10 = vmul.f32 1.442695, %v588_v8 }
 0x37b   :  { %1392 = vpow2.f32 %v602_v59 }
 0x37d   :  { %v1727_v60 = vpop.eup %1388 }
 0x37e   :  { %v1729_v61 = vpop.eup %1390  ;;  %v583_v62 = vpop.xlane.xlu1 %582  ;;  %v614_v26 = vsel %vm155_vm2, %v1727_v60, 0.0 }
 0x37f   :  { %v591_v63 = vsub.f32 %v559_v34, %v583_v62  ;;  %615 = vadd.xlane.f32.xlu0 %v614_v26  ;;  %v617_v1 = vsel %vm155_vm2, %v1729_v61, 0.0  ;;  %v580_v9 = vpop.xlane.xlu0 %579 }
 0x380   :  { %618 = vadd.xlane.f32.xlu1 %v617_v1  ;;  %v590_v11 = vsub.f32 %v1712_v33, %v580_v9 }
 0x381   :  { %v606_v2 = vmul.f32 1.442695, %v591_v63 }
 0x382   :  { %v604_v12 = vmul.f32 1.442695, %v590_v11  ;;  %v754_v14 = vpop.permute.xlu1 %753 }
 0x383   :  { %1394 = vpow2.f32 %v606_v2  ;;  %v802_v13 = vpop.permute.xlu0 %801  ;;  %v759_v29 = vsel %vm661_vm3, %v754_v14, 0 }
 0x384   :  { %1396 = vpow2.f32 %v600_v10  ;;  %v807_v32 = vsel %vm661_vm3, %v802_v13, 0 }
 0x385   :  { %v1735_v3 = vpop.eup %1392  ;;  %1398 = vpow2.f32 %v604_v12 }
 0x386   :  { %v623_v4 = vsel %vm155_vm2, %v1735_v3, 0.0 }
 0x387   :  { %624 = vadd.xlane.f32.xlu1 %v623_v4 }
 0x38d   :  { %v1739_v5 = vpop.eup %1394 }
 0x38e   :  { %v629_v6 = vsel %vm155_vm2, %v1739_v5, 0.0  ;;  %v1749_v16 = vpop.eup %1396 }
 0x38f   :  { %630 = vadd.xlane.f32.xlu1 %v629_v6  ;;  %v1753_v15 = vpop.eup %1398 }
 0x395   :  { %897 = vrot.lane.b32.xlu0 %v1618_v25, %s1511_s25  ;;  %v620_v25 = vsel %vm155_vm2, %v1749_v16, 0.0 }
 0x3a0   :  { %945 = vrot.lane.b32.xlu1 %v1628_v30, %s1511_s25  ;;  %v626_v30 = vsel %vm155_vm2, %v1753_v15, 0.0 }
 0x3b3   :  { %v610_v19 = vpop.xlane.xlu0 %609  ;;  %v613_v20 = vpop.xlane.xlu1 %612 }
 0x3b4   :  { %1400 = vrcp.f32 %v610_v19  ;;  %621 = vadd.xlane.f32.xlu0 %v620_v25 }
 0x3b5   :  { %1402 = vrcp.f32 %v613_v20 }
 0x3b7   :  { %v850_v33 = vpop.permute.xlu1 %849 }
 0x3b8   :  { %627 = vadd.xlane.f32.xlu0 %v626_v30  ;;  %v855_v44 = vsel %vm661_vm3, %v850_v33, 0 }
 0x3be   :  { %v1401_v21 = vpop.eup %1400 }
 0x3bf   :  { %v1403_v22 = vpop.eup %1402  ;;  %v640_v23 = vmul.f32 %v1401_v21, %v1385_v49 }
 0x3c0   :  { %v641_v24 = vmul.f32 %v1403_v22, %v1387_v50 }
 0x3c1   :  { %v648_v27 = vpack.c.bf16 %v640_v23, %v640_v23 }
 0x3c2   :  { %v649_v28 = vpack.c.bf16 %v641_v24, %v641_v24 }
 0x3c3   :  { %1281 = vmatmul.mubr.msk.bf16.vlgmr.msra.gmra.mrb[16].mxu1 %vm155_vm2, %v648_v27  ;;  %v1383_v27 = vld [vmem:[#allocation7 + $0x8] sm:$0xff]  }
 0x3c4   :  { %1287 = vmatmul.mubr.msk.bf16.vlgmr.msra.gmra.mrb[20].mxu0 %vm155_vm2, %v649_v28  ;;  %1291 = vmatpush3.bf16.msra.mxu1 %v759_v29 }
 0x3c5   :  { %1297 = vmatpush3.bf16.msra.mxu0 %v807_v32  ;;  %1292 = vmatprep.mubr.msk.bf16.mxu1 %vm1518_vm0, %v1517_v0 }
 0x3c6   :  { %1298 = vmatprep.mubr.msk.bf16.mxu0 %vm1518_vm0, %v1517_v0  ;;  %1302 = vmatprep.subr.bf16.mxu1 %v1517_v0 }
 0x3c7   :  { %1308 = vmatprep.subr.bf16.mxu0 %v1517_v0 }
 0x3ce   :  { %993 = vrot.lane.b32.xlu0 %v1631_v31, %s1511_s25  ;;  %s1523_s25 = smov 16  }
 0x40c   :  { %v616_v34 = vpop.xlane.xlu0 %615 }
 0x40d   :  { %1404 = vrcp.f32 %v616_v34  ;;  %v619_v35 = vpop.xlane.xlu1 %618 }
 0x40e   :  { %1406 = vrcp.f32 %v619_v35 }
 0x410   :  { %v898_v41 = vpop.permute.xlu0 %897 }
 0x411   :  { %v903_v31 = vsel %vm661_vm3, %v898_v41, 0 }
 0x414   :  { %v625_v36 = vpop.xlane.xlu1 %624 }
 0x415   :  { %1408 = vrcp.f32 %v625_v36 }
 0x417   :  { %v1405_v37 = vpop.eup %1404 }
 0x418   :  { %v1407_v38 = vpop.eup %1406  ;;  %v642_v39 = vmul.f32 %v1405_v37, %v1727_v60 }
 0x419   :  { %v643_v40 = vmul.f32 %v1407_v38, %v1729_v61 }
 0x41a   :  { %v650_v42 = vpack.c.bf16 %v642_v39, %v642_v39 }
 0x41b   :  { %v651_v43 = vpack.c.bf16 %v643_v40, %v643_v40 }
 0x41c   :  { %1293 = vmatmul.mubr.msk.bf16.vlgmr.msra.gmra.mrb[20].mxu1 %vm155_vm2, %v650_v42  ;;  %v631_v48 = vpop.xlane.xlu1 %630 }
 0x41d   :  { %1299 = vmatmul.mubr.msk.bf16.vlgmr.msra.gmra.mrb[24].mxu0 %vm155_vm2, %v651_v43  ;;  %1303 = vmatpush3.bf16.msra.mxu1 %v855_v44  ;;  %1410 = vrcp.f32 %v631_v48 }
 0x41e   :  { %1309 = vmatpush3.bf16.msra.mxu0 %v903_v31  ;;  %1310 = vmatprep.mubr.msk.bf16.mxu0 %vm1518_vm0, %v1517_v0 }
 0x41f   :  { %1320 = vmatprep.subr.bf16.mxu0 %v1517_v0  ;;  %1304 = vmatprep.mubr.msk.bf16.mxu1 %vm1518_vm0, %v1517_v0  ;;  %v1409_v45 = vpop.eup %1408 }
 0x420   :  { %1314 = vmatprep.subr.bf16.mxu1 %v1517_v0  ;;  %v645_v46 = vmul.f32 %v1409_v45, %v1735_v3  ;;  %v946_v56 = vpop.permute.xlu1 %945 }
 0x421   :  { %v951_v59 = vsel %vm661_vm3, %v946_v56, 0 }
 0x422   :  { %v653_v47 = vpack.c.bf16 %v645_v46, %v645_v46 }
 0x425   :  { %1311 = vmatmul.mubr.msk.bf16.vlgmr.msra.gmra.mrb[28].mxu0 %vm155_vm2, %v653_v47 }
 0x426   :  { %1322 = vmatprep.mubr.msk.bf16.mxu0 %vm1518_vm0, %v1517_v0 }
 0x427   :  { %v1411_v50 = vpop.eup %1410 }
 0x428   :  { %v647_v52 = vmul.f32 %v1411_v50, %v1739_v5 }
 0x42a   :  { %v655_v53 = vpack.c.bf16 %v647_v52, %v647_v52 }
 0x441   :  { %v622_v49 = vpop.xlane.xlu0 %621 }
 0x442   :  { %1412 = vrcp.f32 %v622_v49 }
 0x445   :  { %v628_v51 = vpop.xlane.xlu0 %627 }
 0x446   :  { %1414 = vrcp.f32 %v628_v51 }
 0x449   :  { %v994_v17 = vpop.permute.xlu0 %993 }
 0x44a   :  { %v999_v18 = vsel %vm661_vm3, %v994_v17, 0  ;;  %v1180_v17 = vld [vmem:[%s1826_s3] ss:$0 sm:$0xff] }
 0x44b   :  { %1321 = vmatpush3.bf16.msra.mxu0 %v999_v18 }
 0x44c   :  { %v1413_v54 = vpop.eup %1412 }
 0x44d   :  { %v644_v55 = vmul.f32 %v1413_v54, %v1749_v16 }
 0x44e   :  { %1323 = vmatmul.mubr.msk.bf16.vlgmr.msra.gmra.mrb[32].mxu0 %vm155_vm2, %v655_v53 }
 0x44f   :  { %v652_v57 = vpack.c.bf16 %v644_v55, %v644_v55 }
 0x450   :  { %v1415_v58 = vpop.eup %1414 }
 0x451   :  { %1305 = vmatmul.mubr.msk.bf16.vlgmr.msra.gmra.mrb[24].mxu1 %vm155_vm2, %v652_v57  ;;  %v646_v60 = vmul.f32 %v1415_v58, %v1753_v15  ;;  %v1382_v15 = vld [vmem:[#allocation7] sm:$0xff]  }
 0x452   :  { %1315 = vmatpush3.bf16.msra.mxu1 %v951_v59  ;;  %1316 = vmatprep.mubr.msk.bf16.mxu1 %vm1518_vm0, %v1517_v0 }
 0x453   :  { %1326 = vmatprep.subr.bf16.mxu1 %v1517_v0  ;;  %v654_v61 = vpack.c.bf16 %v646_v60, %v646_v60 }
 0x459   :  { %1317 = vmatmul.mubr.msk.bf16.vlgmr.msra.gmra.mrb[28].mxu1 %vm155_vm2, %v654_v61 }
 0x45a   :  { %1330 = vmatprep.mubr.msk.bf16.mxu1 %vm1518_vm0, %v1517_v0  ;;  %1327 = vmatpush3.bf16.msra.mxu1 %v1382_v15 }
 0x45b   :  { %1328 = vmatprep.subr.bf16.mxu1 %v1517_v0 }
 0x45e   :  { %1329 = vmatpush3.bf16.msra.mxu1 %v1383_v27 }
 0x496   :  { %v699_v62 = vpop.f32.mrb[16].mxu1 }
 0x497   :  { %v747_v26 = vpop.f32.mrb[20].mxu0  ;;  %v1282_v63 = vpop.f32.mrb[17].mxu1 }
 0x498   :  { %v1288_v1 = vpop.f32.mrb[21].mxu0  ;;  %v702_v2 = vpop.f32.mrb[18].mxu1 }
 0x499   :  { %v750_v3 = vpop.f32.mrb[22].mxu0  ;;  %v1283_v4 = vpop.f32.mrb[19].mxu1 }
 0x49a   :  { %v1289_v5 = vpop.f32.mrb[23].mxu0 }
 0x4ef   :  { %v795_v6 = vpop.f32.mrb[20].mxu1 }
 0x4f0   :  { %v843_v7 = vpop.f32.mrb[24].mxu0  ;;  %v1294_v8 = vpop.f32.mrb[21].mxu1 }
 0x4f1   :  { %v1365_v9 = vpack.i.bf16 %v843_v7, %v795_v6  ;;  %v1300_v10 = vpop.f32.mrb[25].mxu0  ;;  %v798_v11 = vpop.f32.mrb[22].mxu1 }
 0x4f2   :  { %v846_v12 = vpop.f32.mrb[26].mxu0  ;;  %v1295_v13 = vpop.f32.mrb[23].mxu1 }
 0x4f3   :  { %1366 = vrot.lane.b32.xlu1 %v1365_v9, %s1515_s13  ;;  %v1301_v14 = vpop.f32.mrb[27].mxu0 }
 0x4f8   :  { %v939_v16 = vpop.f32.mrb[28].mxu0 }
 0x4f9   :  { %v1312_v19 = vpop.f32.mrb[29].mxu0 }
 0x4fa   :  { %v942_v20 = vpop.f32.mrb[30].mxu0 }
 0x4fb   :  { %v1313_v25 = vpop.f32.mrb[31].mxu0 }
 0x521   :  { %v1035_v30 = vpop.f32.mrb[32].mxu0 }
 0x522   :  { %v1324_v21 = vpop.f32.mrb[33].mxu0 }
 0x523   :  { %v1038_v22 = vpop.f32.mrb[34].mxu0 }
 0x524   :  { %v891_v23 = vpop.f32.mrb[24].mxu1  ;;  %v1325_v24 = vpop.f32.mrb[35].mxu0 }
 0x525   :  { %v1370_v28 = vpack.i.bf16 %v939_v16, %v891_v23  ;;  %v1306_v29 = vpop.f32.mrb[25].mxu1 }
 0x526   :  { %v894_v32 = vpop.f32.mrb[26].mxu1 }
 0x527   :  { %v1307_v33 = vpop.f32.mrb[27].mxu1  ;;  %1371 = vrot.lane.b32.xlu0 %v1370_v28, %s1523_s25 }
 0x52c   :  { %v987_v34 = vpop.f32.mrb[28].mxu1 }
 0x52d   :  { %v1375_v35 = vpack.i.bf16 %v1035_v30, %v987_v34  ;;  %v1318_v36 = vpop.f32.mrb[29].mxu1 }
 0x52e   :  { %v990_v37 = vpop.f32.mrb[30].mxu1 }
 0x52f   :  { %v1319_v38 = vpop.f32.mrb[31].mxu1  ;;  %1376 = vrot.lane.b32.xlu1 %v1375_v35, %s1524_s5 }
 0x565   :  { %v1367_v0 = vpop.permute.xlu1 %1366 }
 0x566   :  { %v1369_v40 = vunpack.i.h.bf16 %v1367_v0  ;;  %v1368_v41 = vunpack.i.l.bf16 %v1367_v0 }
 0x568   :  { %v1066_v31 = vsel %vm155_vm2, %v747_v26, %v1369_v40  ;;  %v1065_v45 = vsel %vm155_vm2, %v699_v62, %v1368_v41 }
 0x599   :  { %v1372_v39 = vpop.permute.xlu0 %1371 }
 0x59a   :  { %v1374_v42 = vunpack.i.h.bf16 %v1372_v39  ;;  %v1373_v43 = vunpack.i.l.bf16 %v1372_v39 }
 0x59c   :  { %v1069_v48 = vsel %vm1067_vm5, %v1066_v31, %v1374_v42  ;;  %v1068_v49 = vsel %vm1067_vm5, %v1065_v45, %v1373_v43 }
 0x5a1   :  { %v1377_v44 = vpop.permute.xlu1 %1376 }
 0x5a2   :  { %v1379_v46 = vunpack.i.h.bf16 %v1377_v44  ;;  %v1378_v47 = vunpack.i.l.bf16 %v1377_v44 }
 0x5a4   :  { %v1072_v50 = vsel %vm1070_vm6, %v1069_v48, %v1379_v46  ;;  %v1071_v51 = vsel %vm1070_vm6, %v1068_v49, %v1378_v47 }
 0x5a5   :  { %v1073_v52 = vpack.c.bf16 %v1072_v50, %v1071_v51 }
 0x5a7   :  { %1331 = vmatmul.mubr.msk.bf16.vlgmr.msra.gmra.mrb[32].mxu1 %vm79_vm1, %v1073_v52 }
 0x67a   :  { %v1134_v18 = vpop.f32.mrb[32].mxu1 }
 0x67b   :  { %v1135_v54 = vadd.f32 %v1180_v17, %v1134_v18  ;;  %v1332_v53 = vpop.f32.mrb[33].mxu1 }
 0x67c   :  { %v1137_v55 = vpop.f32.mrb[34].mxu1 }
 0x67d   :  { %1141 = vst.msk [vmem:[#allocation8] sm:$0xff] %vm79_vm1, %v1135_v54  ;;  %v1138_v56 = vadd.f32 %v1180_v17, %v1137_v55  ;;  %v1333_v57 = vpop.f32.mrb[35].mxu1 }
 0x67f   :  { %1142 = vst.msk [vmem:[#allocation8 + $0x8] sm:$0xff] %vm79_vm1, %v1138_v56 }
 0x680   :  { %1493 = shalt.err (!%p1490_p0)
}
 0x681   :  { %s1494_s12 = scalar_lea.hbm %s1827_s4, 256 }
 0x682   :  { %p1495_p1 = scmp.ne.s32.totalorder %s1827_s4, %s1494_s12  ;;  %p1498_p2 = scmp.lt.u32.totalorder %s1494_s12, %s1827_s4 }
 0x684   :  { %p1500_p3 = pnand %p1498_p2, %p1495_p1 }
 0x686   :  { %1503 = shalt.err (!%p1500_p3)
}
 0x687   :  { %1154 = dma.vmem_to_hbm [thread:$0]  %s1149_s9, 256, %s1827_s4, [#allocation4], %s1514_s1, %s1514_s1, %s1515_s13  }
 0x688   :  { %1508 = dma.done.wait [#allocation4], 256  }
 0x689   :  { %1509 = vsyncadd [#allocation4], 4294967040 }
 0x68a   :  { %1158 = vsyncpa [#allocation3], 1 }
 0x68b   :  { %1159 = vsyncpa [#allocation6], 1 }
 0x68c   :  { %1160 = vsyncpa [#allocation4], 1 }

</bundles_post_ra>
